<compile_context>
chip_gen: v7x
topology: tpu7x:2x2x1
jax: 0.10.0
libtpu: 0.0.40
codegen_flags: <defaults>
</compile_context>

<pallas_src>
import functools

import jax
import jax.numpy as jnp
from jax.experimental import pallas as pl
from jax.experimental.pallas import tpu as pltpu


def _round_up(x, m):
    return ((x + m - 1) // m) * m


def _cdiv(a, b):
    return -(-a // b)


def _default_num_steps():
    """2 grid steps on megacore chips (2 TensorCores fed by one program), else 1."""
    try:
        kind = jax.devices()[0].device_kind.lower()
    except Exception:
        return 1
    if ("v4" in kind) or ("v5p" in kind) or ("7" in kind):
        return 2
    return 1


def _choose_tile(n, num_steps, *, align=256, max_tn=8192):
    """Column (batch/lane) tile: cover N in `num_steps` lane-aligned tiles.

    align=256 matches the 256-wide MXU pass on v6e/v7x (and is a multiple of
    the 128-lane vreg width, so it is also fine on v5e).  max_tn bounds VMEM.
    """
    tn = _round_up(max(_cdiv(n, max(num_steps, 1)), 1), align)
    return int(min(tn, max_tn))


def _pack_params(params):
    """Pack per-layer (W [fan_out, fan_in], b [fan_out]) into one f32 slab.

    For layer l starting at 8-aligned row r0:
      slab[r0:r0+fan_out, 0:fan_in] = W   (PyTorch [fan_out, fan_in] layout)
      slab[r0:r0+fan_out, fan_in]   = b   (a column -> loads as (fan_out, 1))
    Slab width is a multiple of 128 so the single parameter DMA is lane-dense.
    Returns (slab, layout) with layout = ((r0, fan_in, fan_out), ...) (static).
    """
    max_fan_in = max(w.shape[1] for w, _ in params)
    width = _round_up(max_fan_in + 1, 128)
    blocks, layout, r = [], [], 0
    for w, b in params:
        fan_out, fan_in = w.shape
        layout.append((r, fan_in, fan_out))
        blk = jnp.zeros((fan_out, width), jnp.float32)
        blk = blk.at[:, :fan_in].set(w.astype(jnp.float32))
        blk = blk.at[:, fan_in].set(b.astype(jnp.float32))
        blocks.append(blk)
        r += fan_out
        pad = (-r) % 8
        if pad:
            blocks.append(jnp.zeros((pad, width), jnp.float32))
            r += pad
    return jnp.concatenate(blocks, axis=0), tuple(layout)


def _fused_mlp_kernel(x_ref, p_ref, o_ref, *, layout):
    """Whole MLP on one (feature, tn) tile.

    x_ref : (dim_in, tn)   feature-major input tile (batch on the lane axis)
    p_ref : (R, 128)       packed weight/bias slab (constant across the grid)
    o_ref : (dim_out, tn)  feature-major output tile (lane-dense store)
    """
    h = x_ref[...]
    n_layers = len(layout)
    for l, (r0, fan_in, fan_out) in enumerate(layout):
        w = p_ref[r0:r0 + fan_out, 0:fan_in]             # static slices
        b = p_ref[r0:r0 + fan_out, fan_in:fan_in + 1]    # (fan_out, 1) bias
        # MXU matmul with f32 accumulation; bias add / ReLU on the VPU in f32.
        y = jnp.dot(w, h, preferred_element_type=jnp.float32) + b
        if l != n_layers - 1:
            y = jnp.maximum(y, 0.0)
        h = y
    o_ref[...] = h.astype(o_ref.dtype)


def fused_mlp_feature_major(x_fm, slab, layout, dim_out, *, tn=None,
                            num_steps=None):
    """Fused MLP forward on feature-major activations.

    x_fm : [dim_in, N] f32 (batch on the lane axis).  Returns [dim_out, N].
    """
    din, n = x_fm.shape
    if num_steps is None:
        num_steps = _default_num_steps()
    if tn is None:
        tn = _choose_tile(n, num_steps)
    assert tn % 128 == 0, "column tile must be lane-aligned"
    n_tiles = _cdiv(n, tn)            # partial last block handled by Pallas

    flops = 2 * n * sum(fi * fo for _, fi, fo in layout)
    bytes_accessed = int((din + dim_out) * n * x_fm.dtype.itemsize
                         + slab.size * slab.dtype.itemsize)

    return pl.pallas_call(
        functools.partial(_fused_mlp_kernel, layout=layout),
        out_shape=jax.ShapeDtypeStruct((dim_out, n), x_fm.dtype),
        grid=(n_tiles,),
        in_specs=[
            pl.BlockSpec((din, tn), lambda i: (0, i)),
            pl.BlockSpec(slab.shape, lambda i: (0, 0)),   # whole slab, constant
        ],
        out_specs=pl.BlockSpec((dim_out, tn), lambda i: (0, i)),
        compiler_params=pltpu.CompilerParams(
            dimension_semantics=("parallel",)),
        cost_estimate=pl.CostEstimate(
            flops=flops, transcendentals=0, bytes_accessed=bytes_accessed),
    )(x_fm, slab)


class MLP:
    """JAX/Pallas port of the PyTorch MLP module (same forward semantics, f32)."""

    def __init__(self, dim_in, dim_out, dim_hidden, num_layers, bias=True,
                 key=None):
        self.dim_in = dim_in
        self.dim_out = dim_out
        self.dim_hidden = dim_hidden
        self.num_layers = num_layers

        key = key if key is not None else jax.random.PRNGKey(0)
        # Deterministic init mimicking nn.Linear default: U(-1/sqrt(fan_in), +).
        self.params = []
        for l in range(num_layers):
            fan_in = dim_in if l == 0 else dim_hidden
            fan_out = dim_out if l == num_layers - 1 else dim_hidden
            key, kw, kb = jax.random.split(key, 3)
            bound = 1.0 / float(fan_in) ** 0.5
            w = jax.random.uniform(kw, (fan_out, fan_in), jnp.float32,
                                   -bound, bound)
            b = (jax.random.uniform(kb, (fan_out,), jnp.float32, -bound, bound)
                 if bias else jnp.zeros((fan_out,), jnp.float32))
            self.params.append((w, b))

        # Hoisted per-call preprocessing: pack all weights/biases once.
        self.param_slab, self.param_layout = _pack_params(self.params)

    def apply_feature_major(self, x_fm, *, tn=None, num_steps=None):
        """x_fm: [dim_in, N] -> [dim_out, N].  Zero boundary transposes."""
        return fused_mlp_feature_major(x_fm, self.param_slab,
                                       self.param_layout, self.dim_out,
                                       tn=tn, num_steps=num_steps)

    def __call__(self, x, *, tn=None, num_steps=None):
        """PyTorch-layout compat: x [N, dim_in] -> [N, dim_out].

        The two boundary transposes here are layout plumbing only; production
        code should use apply_feature_major and keep activations
        feature-major end-to-end.
        """
        return self.apply_feature_major(x.T, tn=tn, num_steps=num_steps).T

    def reference(self, x):
        """Pure-JAX row-major reference ([N, dim_in] -> [N, dim_out])."""
        h = x
        for l, (w, b) in enumerate(self.params):
            h = jnp.dot(h, w.T, preferred_element_type=jnp.float32) + b
            if l != self.num_layers - 1:
                h = jnp.maximum(h, 0.0)
        return h


if __name__ == "__main__":
    dim_in, dim_out, dim_hidden, num_layers = 4, 3, 32, 3
    N = 2000  # deliberately NOT a multiple of the tile (exercises partial block)

    mlp = MLP(dim_in, dim_out, dim_hidden, num_layers, bias=True,
              key=jax.random.PRNGKey(0))

    # Primary path: the producer emits feature-major activations [dim_in, N]
    # (review option 1) so there are no boundary transposes at all.
    kx = jax.random.fold_in(jax.random.PRNGKey(0), 1)
    x_fm = jax.random.normal(kx, (dim_in, N), jnp.float32)

    out_fm = jax.block_until_ready(mlp.apply_feature_major(x_fm))
    ref = mlp.reference(x_fm.T)
    assert out_fm.shape == (dim_out, N)
    err_fm = float(jnp.max(jnp.abs(out_fm.T - ref)))
    assert err_fm < 1e-4, err_fm

    # PyTorch-layout compatibility wrapper ([N, dim_in] -> [N, dim_out]).
    out_rm = jax.block_until_ready(mlp(x_fm.T))
    assert out_rm.shape == (N, dim_out)
    err_rm = float(jnp.max(jnp.abs(out_rm - ref)))
    assert err_rm < 1e-4, err_rm

    print("KERNEL_OK")
</pallas_src>

<mosaic_0001>
module attributes {stable_mosaic.version = 11 : i64} {
  func.func @_fused_mlp_kernel(%arg0: i32, %arg1: memref<4x2048xf32, #tpu.memory_space<vmem>>, %arg2: memref<72x128xf32, #tpu.memory_space<vmem>>, %arg3: memref<3x2048xf32, #tpu.memory_space<vmem>>) attributes {dimension_semantics = [#tpu.dimension_semantics<parallel>], iteration_bounds = array<i64: 1>, scalar_prefetch = 0 : i64, scratch_operands = 0 : i64, tpu.core_type = #tpu.core_type<tc>, window_params = [{transform_indices = @transform_0, window_bounds = array<i64: 4, 2048>}, {pipeline_mode = #tpu.pipeline_mode<synchronous>, transform_indices = @transform_1, window_bounds = array<i64: 72, 128>}, {transform_indices = @transform_2, window_bounds = array<i64: 3, 2048>}]} {
    %c0 = arith.constant 0 : index
    %c0_0 = arith.constant 0 : index
    %0 = vector.load %arg1[%c0, %c0_0] : memref<4x2048xf32, #tpu.memory_space<vmem>>, vector<4x2048xf32>
    %c0_1 = arith.constant 0 : index
    %c0_2 = arith.constant 0 : index
    %1 = vector.load %arg2[%c0_1, %c0_2] : memref<72x128xf32, #tpu.memory_space<vmem>>, vector<32x4xf32>
    %c0_3 = arith.constant 0 : index
    %c4 = arith.constant 4 : index
    %2 = vector.load %arg2[%c0_3, %c4] : memref<72x128xf32, #tpu.memory_space<vmem>>, vector<32x1xf32>
    %cst = arith.constant dense<0.000000e+00> : vector<32x2048xf32>
    %3 = tpu.matmul %1, %0, %cst {dimension_numbers = #tpu.dot_dimension_numbers<[1], [0], [0], [1], [0, 0, 1, 1], [], []>} : vector<32x4xf32>, vector<4x2048xf32>, vector<32x2048xf32> -> vector<32x2048xf32>
    %4 = vector.broadcast %2 : vector<32x1xf32> to vector<32x2048xf32>
    %5 = arith.addf %3, %4 : vector<32x2048xf32>
    %cst_4 = arith.constant 0.000000e+00 : f32
    %6 = vector.broadcast %cst_4 : f32 to vector<32x2048xf32>
    %7 = arith.maximumf %5, %6 : vector<32x2048xf32>
    %c32 = arith.constant 32 : index
    %c0_5 = arith.constant 0 : index
    %8 = vector.load %arg2[%c32, %c0_5] : memref<72x128xf32, #tpu.memory_space<vmem>>, vector<32x32xf32>
    %c32_6 = arith.constant 32 : index
    %c32_7 = arith.constant 32 : index
    %9 = vector.load %arg2[%c32_6, %c32_7] : memref<72x128xf32, #tpu.memory_space<vmem>>, vector<32x1xf32>
    %cst_8 = arith.constant dense<0.000000e+00> : vector<32x2048xf32>
    %10 = tpu.matmul %8, %7, %cst_8 {dimension_numbers = #tpu.dot_dimension_numbers<[1], [0], [0], [1], [0, 0, 1, 1], [], []>} : vector<32x32xf32>, vector<32x2048xf32>, vector<32x2048xf32> -> vector<32x2048xf32>
    %11 = vector.broadcast %9 : vector<32x1xf32> to vector<32x2048xf32>
    %12 = arith.addf %10, %11 : vector<32x2048xf32>
    %cst_9 = arith.constant 0.000000e+00 : f32
    %13 = vector.broadcast %cst_9 : f32 to vector<32x2048xf32>
    %14 = arith.maximumf %12, %13 : vector<32x2048xf32>
    %c64 = arith.constant 64 : index
    %c0_10 = arith.constant 0 : index
    %15 = vector.load %arg2[%c64, %c0_10] : memref<72x128xf32, #tpu.memory_space<vmem>>, vector<3x32xf32>
    %c64_11 = arith.constant 64 : index
    %c32_12 = arith.constant 32 : index
    %16 = vector.load %arg2[%c64_11, %c32_12] : memref<72x128xf32, #tpu.memory_space<vmem>>, vector<3x1xf32>
    %cst_13 = arith.constant dense<0.000000e+00> : vector<3x2048xf32>
    %17 = tpu.matmul %15, %14, %cst_13 {dimension_numbers = #tpu.dot_dimension_numbers<[1], [0], [0], [1], [0, 0, 1, 1], [], []>} : vector<3x32xf32>, vector<32x2048xf32>, vector<3x2048xf32> -> vector<3x2048xf32>
    %18 = vector.broadcast %16 : vector<3x1xf32> to vector<3x2048xf32>
    %19 = arith.addf %17, %18 : vector<3x2048xf32>
    %c0_14 = arith.constant 0 : index
    %c0_15 = arith.constant 0 : index
    %20 = vector.load %arg3[%c0_14, %c0_15] : memref<3x2048xf32, #tpu.memory_space<vmem>>, vector<3x2048xf32>
    tpu.vector_store %arg3[%c0_14, %c0_15], %19 {strides = array<i32>} : memref<3x2048xf32, #tpu.memory_space<vmem>>, vector<3x2048xf32>,
    return
  }
  func.func @transform_0(%arg0: i32) -> (i32, i32) {
    %c0_i32 = arith.constant 0 : i32
    %c0_i32_0 = arith.constant 0 : i32
    return %c0_i32, %arg0 : i32, i32
  }
  func.func @transform_1(%arg0: i32) -> (i32, i32) {
    %c0_i32 = arith.constant 0 : i32
    %c0_i32_0 = arith.constant 0 : i32
    %c0_i32_1 = arith.constant 0 : i32
    return %c0_i32, %c0_i32_0 : i32, i32
  }
  func.func @transform_2(%arg0: i32) -> (i32, i32) {
    %c0_i32 = arith.constant 0 : i32
    %c0_i32_0 = arith.constant 0 : i32
    return %c0_i32, %arg0 : i32, i32
  }
}

</mosaic_0001>

<bundles_post_ra>
// kernel: tpu_custom_call.1
= control target key start
LH: loop header
LB: loop body
LE: loop exit
PB: predicated region body
PF: predicated region fallthrough
CT: control target
= control target key end

     0   :  { %7 = vsyncpa [#allocation3], 0  ;;  %s3108_s0 = inlined_call_operand.hbm [shape: f32[4,2000], index: 0, kind: input, shape index: {}]   ;;  %s3109_s1 = inlined_call_operand.hbm [shape: f32[72,128], index: 1, kind: input, shape index: {}]   ;;  %s3110_s2 = inlined_call_operand.hbm [shape: f32[3,2000], index: 2, kind: output, shape index: {}]  }
   0x1   :  { %8 = vsyncpa [#allocation6], 0 }
   0x2   :  { %9 = vsyncpa [#allocation4], 0  ;;  %s2654_s9 = smov [#allocation2]   ;;  %s2655_s11 = smov [#allocation5]  }
   0x3   :  { %s16_s10 = sshll.u32 %s2654_s9, 4  ;;  %s25_s12 = sshll.u32 %s2655_s11, 4  ;;  %s17_s10 = int_to_ptr.vmem [resolvable:$true] %s16_s10  ;;  %s2677_s12 = int_to_ptr.vmem [resolvable:$true] %s25_s12 }
   0x4   :  { %s2582_s15 = scalar_lea.hbm %s3108_s0, 1024 }
   0x5   :  { %p2583_p0 = scmp.ne.s32.totalorder %s3108_s0, %s2582_s15  ;;  %p2586_p1 = scmp.lt.u32.totalorder %s2582_s15, %s3108_s0 }
   0x7   :  { %p2588_p2 = pnand %p2586_p1, %p2583_p0 }
   0x9   :  { %2591 = shalt.err (!%p2588_p2)
}
   0xa   :  { %s2592_s20 = scalar_lea.vmem %s17_s10, 1024  ;;  %p2597_p4 = scmp.lt.s32.totalorder %s17_s10, %s17_s10 }
   0xb   :  { %p2593_p3 = scmp.ne.s32.totalorder %s17_s10, %s2592_s20  ;;  %p2598_p5 = scmp.lt.s32.totalorder %s2592_s20, %s2592_s20 }
   0xd   :  { %p2599_p6 = por %p2598_p5, %p2597_p4 }
   0xf   :  { %p2600_p7 = pnand %p2599_p6, %p2593_p3 }
  0x11   :  { %2603 = shalt.err (!%p2600_p7)
}
  0x12   :  { %19 = dma.hbm_to_vmem [thread:$0]  %s3108_s0, 1024, %s17_s10, [#allocation3]  }
  0x13   :  { %s2604_s25 = scalar_lea.hbm %s3109_s1, 1152 }
  0x14   :  { %p2605_p8 = scmp.ne.s32.totalorder %s3109_s1, %s2604_s25  ;;  %p2608_p9 = scmp.lt.u32.totalorder %s2604_s25, %s3109_s1 }
  0x16   :  { %p2610_p10 = pnand %p2608_p9, %p2605_p8 }
  0x18   :  { %2613 = shalt.err (!%p2610_p10)
}
  0x19   :  { %s2614_s30 = scalar_lea.vmem %s2677_s12, 1152  ;;  %p2619_p12 = scmp.lt.s32.totalorder %s2677_s12, %s2677_s12 }
  0x1a   :  { %p2615_p11 = scmp.ne.s32.totalorder %s2677_s12, %s2614_s30  ;;  %p2620_p13 = scmp.lt.s32.totalorder %s2614_s30, %s2614_s30 }
  0x1c   :  { %p2621_p0 = por %p2620_p13, %p2619_p12 }
  0x1e   :  { %p2622_p1 = pnand %p2621_p0, %p2615_p11 }
  0x20   :  { %2625 = shalt.err (!%p2622_p1)
}
  0x21   :  { %s2656_s0 = smov 128   ;;  %s2657_s3 = smov 8  }
  0x22   :  { %31 = dma.hbm_to_vmem [thread:$0]  %s3109_s1, 1152, %s2677_s12, [#allocation6], %s2656_s0, %s2656_s0, %s2657_s3  }
  0x23   :  { %2648 = dma.done.wait [#allocation3], 1024  }
  0x24   :  { %2649 = vsyncadd [#allocation3], 4294966272 }
  0x25   :  { %2650 = dma.done.wait [#allocation6], 1152  }
  0x26   :  { %2651 = vsyncadd [#allocation6], 4294966144  ;;  %v2658_v0 = vmov 0.0   ;;  %v2659_v1 = vmov 4   ;;  %v38_v2 = vld [vmem:[#allocation2] sm:$0xff]  ;;  %vm95_vm0 = vcmask 1043456  }
  0x27   :  { %192 = vmatprep.mubr.f32.mxu0 %v2658_v0  ;;  %281 = vmatprep.mubr.f32.mxu1 %v2658_v0  ;;  %v39_v3 = vld [vmem:[#allocation2 + $0x8] sm:$0xff]  ;;  %v2710_v4 = vld [vmem:[#allocation5] sm:$0xff]  ;;  %v78_v5 = vcombine.high %v38_v2, %v38_v2  ;;  %v40_v7 = vld [vmem:[#allocation2 + $0x10] sm:$0xff]  ;;  %vm86_vm1 = vcmask 31744   ;;  %v2660_v24 = vmov 32   ;;  %vm928_vm2 = vcmask 261120  }
  0x28   :  { %2569 = vset.pattern.permute.xlu0 %v2659_v1  ;;  %2570 = vset.pattern.permute.xlu1 %v2659_v1  ;;  %v79_v6 = vcombine.high %v39_v3, %v39_v3  ;;  %v41_v8 = vld [vmem:[#allocation2 + $0x18] sm:$0xff]  ;;  %v80_v9 = vcombine.high %v40_v7, %v40_v7  ;;  %v42_v11 = vld [vmem:[#allocation2 + $0x20] sm:$0xff]  ;;  %v43_v12 = vld [vmem:[#allocation2 + $0x28] sm:$0xff]  ;;  %s2661_s1 = smov [#allocation7]  }
  0x29   :  { %52 = vperm.xlu0 %2569, %v2710_v4   ;;  %2345 = vmatprep.subr.msk.mxu0 %vm95_vm0, %v78_v5  ;;  %v81_v10 = vcombine.high %v41_v8, %v41_v8  ;;  %v2723_v13 = vld [vmem:[#allocation5 + $0x8] sm:$0xff]  ;;  %v82_v14 = vcombine.high %v42_v11, %v42_v11  ;;  %v83_v15 = vcombine.high %v43_v12, %v43_v12  ;;  %v2735_v16 = vld [vmem:[#allocation5 + $0x10] sm:$0xff]  ;;  %v49_v17 = vld [vmem:[#allocation5 + $0x18] sm:$0xff]  ;;  %s2335_s6 = sshll.u32 %s2661_s1, 4  ;;  %s2336_s6 = int_to_ptr.vmem [resolvable:$true] %s2335_s6 }
  0x2a   :  { %2351 = vmatprep.subr.msk.mxu1 %vm95_vm0, %v79_v6  ;;  %2346 = vmatpush1.msk.msra.mxu0 %vm95_vm0, %v38_v2  ;;  %v44_v18 = vld [vmem:[#allocation2 + $0x30] sm:$0xff]  ;;  %v45_v19 = vld [vmem:[#allocation2 + $0x38] sm:$0xff]  ;;  %v2823_v22 = vld [vmem:[#allocation5 + $0x20] sm:$0xff]  ;;  %s2626_s7 = scalar_lea.vmem %s2336_s6, 1024  ;;  %p2631_p3 = scmp.lt.s32.totalorder %s2336_s6, %s2336_s6 }
  0x2b   :  { %2352 = vmatpush1.msk.msra.mxu1 %vm95_vm0, %v39_v3  ;;  %2347 = vmatmul.mubr.msk.f32.vlgmr.msra.gmra.mrb[0].mxu0 %vm86_vm1, %v2710_v4  ;;  %v84_v20 = vcombine.high %v44_v18, %v44_v18  ;;  %v85_v21 = vcombine.high %v45_v19, %v45_v19  ;;  %v2825_v23 = vld [vmem:[#allocation5 + $0x28] sm:$0xff]  ;;  %v2829_v25 = vld [vmem:[#allocation5 + $0x30] sm:$0xff]  ;;  %v2831_v26 = vld [vmem:[#allocation5 + $0x38] sm:$0xff]  ;;  %p2627_p2 = scmp.ne.s32.totalorder %s2336_s6, %s2626_s7  ;;  %p2632_p4 = scmp.lt.s32.totalorder %s2626_s7, %s2626_s7 }
  0x2c   :  { %2353 = vmatmul.mubr.msk.f32.vlgmr.msra.gmra.mrb[0].mxu1 %vm86_vm1, %v2710_v4  ;;  %198 = vmatprep.mubr.f32.mxu0 %v2658_v0  ;;  %v2835_v27 = vld [vmem:[#allocation5 + $0x40] sm:$0x7] }
  0x2d   :  { %287 = vmatprep.mubr.f32.mxu1 %v2658_v0  ;;  %2357 = vmatprep.subr.msk.mxu0 %vm95_vm0, %v80_v9  ;;  %p2633_p5 = por %p2632_p4, %p2631_p3 }
  0x2e   :  { %2363 = vmatprep.subr.msk.mxu1 %vm95_vm0, %v81_v10  ;;  %2358 = vmatpush1.msk.msra.mxu0 %vm95_vm0, %v40_v7 }
  0x2f   :  { %2364 = vmatpush1.msk.msra.mxu1 %vm95_vm0, %v41_v8  ;;  %2348 = vmatmul.mubr.msk.f32.gmra.mrb[2].mxu0 %vm86_vm1, %v2723_v13  ;;  %p2634_p6 = pnand %p2633_p5, %p2627_p2 }
  0x30   :  { %2354 = vmatmul.mubr.msk.f32.gmra.mrb[2].mxu1 %vm86_vm1, %v2723_v13  ;;  %204 = vmatprep.mubr.f32.mxu0 %v2658_v0 }
  0x31   :  { %293 = vmatprep.mubr.f32.mxu1 %v2658_v0  ;;  %2369 = vmatprep.subr.msk.mxu0 %vm95_vm0, %v82_v14 }
  0x32   :  { %2375 = vmatprep.subr.msk.mxu1 %vm95_vm0, %v83_v15  ;;  %57 = vperm.xlu0 %2569, %v2723_v13  }
  0x33   :  { %62 = vperm.xlu1 %2570, %v2735_v16   ;;  %2349 = vmatmul.mubr.msk.f32.gmra.mrb[4].mxu0 %vm86_vm1, %v2735_v16 }
  0x34   :  { %2355 = vmatmul.mubr.msk.f32.gmra.mrb[4].mxu1 %vm86_vm1, %v2735_v16  ;;  %210 = vmatprep.mubr.f32.mxu0 %v2658_v0 }
  0x35   :  { %299 = vmatprep.mubr.f32.mxu1 %v2658_v0 }
  0x36   :  { %2571 = vset.pattern.permute.xlu0 %v2660_v24 }
  0x37   :  { %67 = vperm.xlu1 %2570, %v49_v17   ;;  %2350 = vmatmul.mubr.msk.f32.gmra.mrb[6].mxu0 %vm86_vm1, %v49_v17 }
  0x38   :  { %2356 = vmatmul.mubr.msk.f32.gmra.mrb[6].mxu1 %vm86_vm1, %v49_v17  ;;  %370 = vmatprep.mubr.f32.mxu0 %v2658_v0 }
  0x39   :  { %459 = vmatprep.mubr.f32.mxu1 %v2658_v0  ;;  %910 = vperm.xlu0 %2571, %v2823_v22  }
  0x3b   :  { %2359 = vmatmul.mubr.msk.f32.vlgmr.msra.gmra.mrb[8].mxu0 %vm86_vm1, %v2710_v4  ;;  %2572 = vset.pattern.permute.xlu1 %v2660_v24 }
  0x3c   :  { %2365 = vmatmul.mubr.msk.f32.vlgmr.msra.gmra.mrb[8].mxu1 %vm86_vm1, %v2710_v4  ;;  %376 = vmatprep.mubr.f32.mxu0 %v2658_v0 }
  0x3d   :  { %465 = vmatprep.mubr.f32.mxu1 %v2658_v0  ;;  %2370 = vmatpush1.msk.msra.mxu0 %vm95_vm0, %v42_v11 }
  0x3e   :  { %2376 = vmatpush1.msk.msra.mxu1 %vm95_vm0, %v43_v12  ;;  %2381 = vmatprep.subr.msk.mxu0 %vm95_vm0, %v84_v20 }
  0x3f   :  { %2387 = vmatprep.subr.msk.mxu1 %vm95_vm0, %v85_v21  ;;  %2360 = vmatmul.mubr.msk.f32.gmra.mrb[10].mxu0 %vm86_vm1, %v2723_v13 }
  0x40   :  { %2366 = vmatmul.mubr.msk.f32.gmra.mrb[10].mxu1 %vm86_vm1, %v2723_v13  ;;  %382 = vmatprep.mubr.f32.mxu0 %v2658_v0 }
  0x41   :  { %471 = vmatprep.mubr.f32.mxu1 %v2658_v0  ;;  %915 = vperm.xlu1 %2572, %v2825_v23  }
  0x42   :  { %925 = vperm.xlu0 %2571, %v2831_v26  }
  0x43   :  { %2361 = vmatmul.mubr.msk.f32.gmra.mrb[12].mxu0 %vm86_vm1, %v2735_v16 }
  0x44   :  { %2367 = vmatmul.mubr.msk.f32.gmra.mrb[12].mxu1 %vm86_vm1, %v2735_v16  ;;  %388 = vmatprep.mubr.f32.mxu0 %v2658_v0 }
  0x45   :  { %477 = vmatprep.mubr.f32.mxu1 %v2658_v0  ;;  %920 = vperm.xlu1 %2572, %v2829_v25  }
  0x47   :  { %2362 = vmatmul.mubr.msk.f32.gmra.mrb[14].mxu0 %vm86_vm1, %v49_v17 }
  0x48   :  { %2368 = vmatmul.mubr.msk.f32.gmra.mrb[14].mxu1 %vm86_vm1, %v49_v17  ;;  %548 = vmatprep.mubr.f32.mxu0 %v2658_v0 }
  0x49   :  { %637 = vmatprep.mubr.f32.mxu1 %v2658_v0  ;;  %1716 = vperm.xlu1 %2572, %v2835_v27  }
  0x4b   :  { %2371 = vmatmul.mubr.msk.f32.vlgmr.msra.gmra.mrb[16].mxu0 %vm86_vm1, %v2710_v4 }
  0x4c   :  { %2377 = vmatmul.mubr.msk.f32.vlgmr.msra.gmra.mrb[16].mxu1 %vm86_vm1, %v2710_v4  ;;  %554 = vmatprep.mubr.f32.mxu0 %v2658_v0 }
  0x4d   :  { %643 = vmatprep.mubr.f32.mxu1 %v2658_v0  ;;  %2382 = vmatpush1.msk.msra.mxu0 %vm95_vm0, %v44_v18 }
  0x4e   :  { %2388 = vmatpush1.msk.msra.mxu1 %vm95_vm0, %v45_v19 }
  0x4f   :  { %2372 = vmatmul.mubr.msk.f32.gmra.mrb[18].mxu0 %vm86_vm1, %v2723_v13 }
  0x50   :  { %2378 = vmatmul.mubr.msk.f32.gmra.mrb[18].mxu1 %vm86_vm1, %v2723_v13  ;;  %560 = vmatprep.mubr.f32.mxu0 %v2658_v0 }
  0x51   :  { %649 = vmatprep.mubr.f32.mxu1 %v2658_v0 }
  0x53   :  { %2373 = vmatmul.mubr.msk.f32.gmra.mrb[20].mxu0 %vm86_vm1, %v2735_v16 }
  0x54   :  { %2379 = vmatmul.mubr.msk.f32.gmra.mrb[20].mxu1 %vm86_vm1, %v2735_v16  ;;  %566 = vmatprep.mubr.f32.mxu0 %v2658_v0 }
  0x55   :  { %655 = vmatprep.mubr.f32.mxu1 %v2658_v0 }
  0x57   :  { %2374 = vmatmul.mubr.msk.f32.gmra.mrb[22].mxu0 %vm86_vm1, %v49_v17 }
  0x58   :  { %2380 = vmatmul.mubr.msk.f32.gmra.mrb[22].mxu1 %vm86_vm1, %v49_v17  ;;  %726 = vmatprep.mubr.f32.mxu0 %v2658_v0 }
  0x59   :  { %815 = vmatprep.mubr.f32.mxu1 %v2658_v0 }
  0x5b   :  { %2383 = vmatmul.mubr.msk.f32.vlgmr.msra.gmra.mrb[24].mxu0 %vm86_vm1, %v2710_v4 }
  0x5c   :  { %2389 = vmatmul.mubr.msk.f32.vlgmr.msra.gmra.mrb[24].mxu1 %vm86_vm1, %v2710_v4  ;;  %732 = vmatprep.mubr.f32.mxu0 %v2658_v0 }
  0x5d   :  { %821 = vmatprep.mubr.f32.mxu1 %v2658_v0 }
  0x5f   :  { %2384 = vmatmul.mubr.msk.f32.gmra.mrb[26].mxu0 %vm86_vm1, %v2723_v13 }
  0x60   :  { %2390 = vmatmul.mubr.msk.f32.gmra.mrb[26].mxu1 %vm86_vm1, %v2723_v13  ;;  %738 = vmatprep.mubr.f32.mxu0 %v2658_v0 }
  0x61   :  { %827 = vmatprep.mubr.f32.mxu1 %v2658_v0 }
  0x63   :  { %2385 = vmatmul.mubr.msk.f32.gmra.mrb[28].mxu0 %vm86_vm1, %v2735_v16 }
  0x64   :  { %2391 = vmatmul.mubr.msk.f32.gmra.mrb[28].mxu1 %vm86_vm1, %v2735_v16  ;;  %744 = vmatprep.mubr.f32.mxu0 %v2658_v0 }
  0x65   :  { %833 = vmatprep.mubr.f32.mxu1 %v2658_v0 }
  0x67   :  { %2386 = vmatmul.mubr.msk.f32.gmra.mrb[30].mxu0 %vm86_vm1, %v49_v17 }
  0x68   :  { %2392 = vmatmul.mubr.msk.f32.gmra.mrb[30].mxu1 %vm86_vm1, %v49_v17  ;;  %1001 = vmatprep.mubr.f32.mxu0 %v2658_v0 }
  0x69   :  { %1090 = vmatprep.mubr.f32.mxu1 %v2658_v0 }
  0xa8   :  { %v2838_v28 = vpop.permute.xlu0 %52 }
  0xb1   :  { %v2840_v33 = vpop.permute.xlu0 %57 }
  0xb2   :  { %v2844_v36 = vpop.permute.xlu1 %62 }
  0xb6   :  { %v2854_v2 = vpop.permute.xlu1 %67 }
  0xfe   :  { %v194_v29 = vpop.f32.mrb[0].mxu0 }
  0xff   :  { %v283_v30 = vpop.f32.mrb[0].mxu1  ;;  %v196_v31 = vpop.f32.mrb[1].mxu0  ;;  %v195_v34 = vadd.f32 %v194_v29, %v2838_v28 }
 0x100   :  { %v285_v32 = vpop.f32.mrb[1].mxu1  ;;  %v284_v35 = vadd.f32 %v283_v30, %v2838_v28  ;;  %v197_v37 = vadd.f32 %v196_v31, %v2838_v28 }
 0x101   :  { %v286_v38 = vadd.f32 %v285_v32, %v2838_v28  ;;  %v840_v47 = vmax.f32 %v195_v34, 0.0 }
 0x102   :  { %v200_v39 = vpop.f32.mrb[2].mxu0  ;;  %v842_v48 = vmax.f32 %v284_v35, 0.0  ;;  %v841_v51 = vmax.f32 %v197_v37, 0.0 }
 0x103   :  { %v289_v40 = vpop.f32.mrb[2].mxu1  ;;  %v201_v41 = vadd.f32 %v200_v39, %v2840_v33  ;;  %v202_v43 = vpop.f32.mrb[3].mxu0  ;;  %v843_v52 = vmax.f32 %v286_v38, 0.0 }
 0x104   :  { %v290_v42 = vadd.f32 %v289_v40, %v2840_v33  ;;  %v291_v44 = vpop.f32.mrb[3].mxu1  ;;  %v203_v45 = vadd.f32 %v202_v43, %v2840_v33 }
 0x105   :  { %v292_v46 = vadd.f32 %v291_v44, %v2840_v33  ;;  %v856_v49 = vmax.f32 %v201_v41, 0.0 }
 0x106   :  { %v858_v50 = vmax.f32 %v290_v42, 0.0  ;;  %v857_v53 = vmax.f32 %v203_v45, 0.0  ;;  %v206_v55 = vpop.f32.mrb[4].mxu0 }
 0x107   :  { %v859_v54 = vmax.f32 %v292_v46, 0.0  ;;  %v295_v56 = vpop.f32.mrb[4].mxu1  ;;  %v2435_v57 = vpack.c.bf16 %v856_v49, %v840_v47  ;;  %v208_v59 = vpop.f32.mrb[5].mxu0  ;;  %v207_v63 = vadd.f32 %v206_v55, %v2844_v36 }
 0x108   :  { %v2443_v58 = vpack.c.bf16 %v858_v50, %v842_v48  ;;  %v297_v60 = vpop.f32.mrb[5].mxu1  ;;  %v2433_v61 = vpack.c.bf16 %v857_v53, %v841_v51  ;;  %v296_v1 = vadd.f32 %v295_v56, %v2844_v36  ;;  %v209_v3 = vadd.f32 %v208_v59, %v2844_v36 }
 0x109   :  { %v2441_v62 = vpack.c.bf16 %v859_v54, %v843_v52  ;;  %v298_v4 = vadd.f32 %v297_v60, %v2844_v36  ;;  %v872_v13 = vmax.f32 %v207_v63, 0.0 }
 0x10a   :  { %v212_v5 = vpop.f32.mrb[6].mxu0  ;;  %2434 = vmatprep.subr.bf16.mxu0 %v2433_v61  ;;  %v874_v14 = vmax.f32 %v296_v1, 0.0  ;;  %v873_v17 = vmax.f32 %v209_v3, 0.0 }
 0x10b   :  { %v301_v6 = vpop.f32.mrb[6].mxu1  ;;  %2442 = vmatprep.subr.bf16.mxu1 %v2441_v62  ;;  %v213_v7 = vadd.f32 %v212_v5, %v2854_v2  ;;  %v214_v9 = vpop.f32.mrb[7].mxu0  ;;  %2436 = vmatpush1.bf16.msra.mxu0 %v2435_v57  ;;  %v875_v18 = vmax.f32 %v298_v4, 0.0 }
 0x10c   :  { %v302_v8 = vadd.f32 %v301_v6, %v2854_v2  ;;  %v303_v10 = vpop.f32.mrb[7].mxu1  ;;  %2444 = vmatpush1.bf16.msra.mxu1 %v2443_v58  ;;  %v215_v11 = vadd.f32 %v214_v9, %v2854_v2 }
 0x10d   :  { %v304_v12 = vadd.f32 %v303_v10, %v2854_v2  ;;  %v888_v15 = vmax.f32 %v213_v7, 0.0 }
 0x10e   :  { %v890_v16 = vmax.f32 %v302_v8, 0.0  ;;  %v889_v19 = vmax.f32 %v215_v11, 0.0  ;;  %v372_v21 = vpop.f32.mrb[8].mxu0 }
 0x10f   :  { %v891_v20 = vmax.f32 %v304_v12, 0.0  ;;  %v461_v24 = vpop.f32.mrb[8].mxu1  ;;  %v2439_v29 = vpack.c.bf16 %v888_v15, %v872_v13  ;;  %v374_v31 = vpop.f32.mrb[9].mxu0  ;;  %v373_v37 = vadd.f32 %v372_v21, %v2838_v28 }
 0x110   :  { %v2447_v30 = vpack.c.bf16 %v890_v16, %v874_v14  ;;  %v463_v32 = vpop.f32.mrb[9].mxu1  ;;  %v2437_v34 = vpack.c.bf16 %v889_v19, %v873_v17  ;;  %v462_v38 = vadd.f32 %v461_v24, %v2838_v28  ;;  %v375_v39 = vadd.f32 %v374_v31, %v2838_v28 }
 0x111   :  { %v2445_v35 = vpack.c.bf16 %v891_v20, %v875_v18  ;;  %v464_v40 = vadd.f32 %v463_v32, %v2838_v28  ;;  %v844_v49 = vmax.f32 %v373_v37, 0.0 }
 0x112   :  { %v378_v41 = vpop.f32.mrb[10].mxu0  ;;  %2438 = vmatprep.subr.bf16.mxu0 %v2437_v34  ;;  %v846_v50 = vmax.f32 %v462_v38, 0.0  ;;  %v845_v53 = vmax.f32 %v375_v39, 0.0 }
 0x113   :  { %v467_v42 = vpop.f32.mrb[10].mxu1  ;;  %2446 = vmatprep.subr.bf16.mxu1 %v2445_v35  ;;  %v379_v43 = vadd.f32 %v378_v41, %v2840_v33  ;;  %v380_v45 = vpop.f32.mrb[11].mxu0  ;;  %2440 = vmatpush1.bf16.msra.mxu0 %v2439_v29  ;;  %v847_v54 = vmax.f32 %v464_v40, 0.0 }
 0x114   :  { %v468_v44 = vadd.f32 %v467_v42, %v2840_v33  ;;  %v469_v46 = vpop.f32.mrb[11].mxu1  ;;  %2448 = vmatpush1.bf16.msra.mxu1 %v2447_v30  ;;  %v381_v47 = vadd.f32 %v380_v45, %v2840_v33 }
 0x115   :  { %v470_v48 = vadd.f32 %v469_v46, %v2840_v33  ;;  %v860_v51 = vmax.f32 %v379_v43, 0.0 }
 0x116   :  { %v862_v52 = vmax.f32 %v468_v44, 0.0  ;;  %v861_v55 = vmax.f32 %v381_v47, 0.0  ;;  %v384_v57 = vpop.f32.mrb[12].mxu0  ;;  %2393 = vmatmul.mubr.msk.f32.vlgmr.msra.gmra.mrb[32].mxu0 %vm928_vm2, %v2823_v22 }
 0x117   :  { %v863_v56 = vmax.f32 %v470_v48, 0.0  ;;  %v473_v58 = vpop.f32.mrb[12].mxu1  ;;  %2397 = vmatmul.mubr.msk.f32.vlgmr.msra.gmra.mrb[32].mxu1 %vm928_vm2, %v2823_v22  ;;  %v2451_v59 = vpack.c.bf16 %v860_v51, %v844_v49  ;;  %v386_v61 = vpop.f32.mrb[13].mxu0  ;;  %1007 = vmatprep.mubr.f32.mxu0 %v2658_v0  ;;  %v385_v3 = vadd.f32 %v384_v57, %v2844_v36 }
 0x118   :  { %v2459_v60 = vpack.c.bf16 %v862_v52, %v846_v50  ;;  %v475_v62 = vpop.f32.mrb[13].mxu1  ;;  %v2449_v63 = vpack.c.bf16 %v861_v55, %v845_v53  ;;  %1096 = vmatprep.mubr.f32.mxu1 %v2658_v0  ;;  %v474_v4 = vadd.f32 %v473_v58, %v2844_v36  ;;  %v387_v5 = vadd.f32 %v386_v61, %v2844_v36 }
 0x119   :  { %v2457_v1 = vpack.c.bf16 %v863_v56, %v847_v54  ;;  %v476_v6 = vadd.f32 %v475_v62, %v2844_v36  ;;  %v876_v15 = vmax.f32 %v385_v3, 0.0 }
 0x11a   :  { %v390_v7 = vpop.f32.mrb[14].mxu0  ;;  %2394 = vmatmul.mubr.msk.f32.gmra.mrb[34].mxu0 %vm928_vm2, %v2825_v23  ;;  %2450 = vmatprep.subr.bf16.mxu0 %v2449_v63  ;;  %v878_v16 = vmax.f32 %v474_v4, 0.0  ;;  %v877_v19 = vmax.f32 %v387_v5, 0.0 }
 0x11b   :  { %v479_v8 = vpop.f32.mrb[14].mxu1  ;;  %2398 = vmatmul.mubr.msk.f32.gmra.mrb[34].mxu1 %vm928_vm2, %v2825_v23  ;;  %v391_v9 = vadd.f32 %v390_v7, %v2854_v2  ;;  %2458 = vmatprep.subr.bf16.mxu1 %v2457_v1  ;;  %v392_v11 = vpop.f32.mrb[15].mxu0  ;;  %v879_v20 = vmax.f32 %v476_v6, 0.0 }
 0x11c   :  { %v480_v10 = vadd.f32 %v479_v8, %v2854_v2  ;;  %v481_v12 = vpop.f32.mrb[15].mxu1  ;;  %v393_v13 = vadd.f32 %v392_v11, %v2854_v2  ;;  %2452 = vmatpush1.bf16.msra.mxu0 %v2451_v59  ;;  %2460 = vmatpush1.bf16.msra.mxu1 %v2459_v60 }
 0x11d   :  { %v482_v14 = vadd.f32 %v481_v12, %v2854_v2  ;;  %v892_v17 = vmax.f32 %v391_v9, 0.0  ;;  %1013 = vmatprep.mubr.f32.mxu0 %v2658_v0  ;;  %1102 = vmatprep.mubr.f32.mxu1 %v2658_v0 }
 0x11e   :  { %v894_v18 = vmax.f32 %v480_v10, 0.0  ;;  %v893_v21 = vmax.f32 %v393_v13, 0.0  ;;  %v550_v29 = vpop.f32.mrb[16].mxu0  ;;  %2395 = vmatmul.mubr.msk.f32.gmra.mrb[36].mxu0 %vm928_vm2, %v2829_v25 }
 0x11f   :  { %v895_v24 = vmax.f32 %v482_v14, 0.0  ;;  %v639_v30 = vpop.f32.mrb[16].mxu1  ;;  %2399 = vmatmul.mubr.msk.f32.gmra.mrb[36].mxu1 %vm928_vm2, %v2829_v25  ;;  %v2455_v31 = vpack.c.bf16 %v892_v17, %v876_v15  ;;  %v552_v34 = vpop.f32.mrb[17].mxu0  ;;  %1019 = vmatprep.mubr.f32.mxu0 %v2658_v0  ;;  %v551_v39 = vadd.f32 %v550_v29, %v2838_v28 }
 0x120   :  { %v2463_v32 = vpack.c.bf16 %v894_v18, %v878_v16  ;;  %v641_v35 = vpop.f32.mrb[17].mxu1  ;;  %v2453_v37 = vpack.c.bf16 %v893_v21, %v877_v19  ;;  %1108 = vmatprep.mubr.f32.mxu1 %v2658_v0  ;;  %v640_v40 = vadd.f32 %v639_v30, %v2838_v28  ;;  %v553_v41 = vadd.f32 %v552_v34, %v2838_v28 }
 0x121   :  { %v2461_v38 = vpack.c.bf16 %v895_v24, %v879_v20  ;;  %v642_v42 = vadd.f32 %v641_v35, %v2838_v28  ;;  %v848_v51 = vmax.f32 %v551_v39, 0.0 }
 0x122   :  { %v556_v43 = vpop.f32.mrb[18].mxu0  ;;  %2396 = vmatmul.mubr.msk.f32.gmra.mrb[38].mxu0 %vm928_vm2, %v2831_v26  ;;  %2454 = vmatprep.subr.bf16.mxu0 %v2453_v37  ;;  %v850_v52 = vmax.f32 %v640_v40, 0.0  ;;  %v849_v55 = vmax.f32 %v553_v41, 0.0 }
 0x123   :  { %v645_v44 = vpop.f32.mrb[18].mxu1  ;;  %2400 = vmatmul.mubr.msk.f32.gmra.mrb[38].mxu1 %vm928_vm2, %v2831_v26  ;;  %v557_v45 = vadd.f32 %v556_v43, %v2840_v33  ;;  %2462 = vmatprep.subr.bf16.mxu1 %v2461_v38  ;;  %v558_v47 = vpop.f32.mrb[19].mxu0  ;;  %v851_v56 = vmax.f32 %v642_v42, 0.0 }
 0x124   :  { %v646_v46 = vadd.f32 %v645_v44, %v2840_v33  ;;  %v647_v48 = vpop.f32.mrb[19].mxu1  ;;  %v559_v49 = vadd.f32 %v558_v47, %v2840_v33  ;;  %2456 = vmatpush1.bf16.msra.mxu0 %v2455_v31  ;;  %2464 = vmatpush1.bf16.msra.mxu1 %v2463_v32 }
 0x125   :  { %v648_v50 = vadd.f32 %v647_v48, %v2840_v33  ;;  %v864_v53 = vmax.f32 %v557_v45, 0.0  ;;  %1179 = vmatprep.mubr.f32.mxu0 %v2658_v0  ;;  %1268 = vmatprep.mubr.f32.mxu1 %v2658_v0 }
 0x126   :  { %v866_v54 = vmax.f32 %v646_v46, 0.0  ;;  %v865_v57 = vmax.f32 %v559_v49, 0.0  ;;  %v562_v59 = vpop.f32.mrb[20].mxu0 }
 0x127   :  { %v867_v58 = vmax.f32 %v648_v50, 0.0  ;;  %v651_v60 = vpop.f32.mrb[20].mxu1  ;;  %v2467_v61 = vpack.c.bf16 %v864_v53, %v848_v51  ;;  %2401 = vmatmul.mubr.msk.f32.vlgmr.msra.gmra.mrb[40].mxu0 %vm928_vm2, %v2823_v22  ;;  %v564_v63 = vpop.f32.mrb[21].mxu0  ;;  %2405 = vmatmul.mubr.msk.f32.vlgmr.msra.gmra.mrb[40].mxu1 %vm928_vm2, %v2823_v22  ;;  %v563_v5 = vadd.f32 %v562_v59, %v2844_v36 }
 0x128   :  { %v2475_v62 = vpack.c.bf16 %v866_v54, %v850_v52  ;;  %v653_v1 = vpop.f32.mrb[21].mxu1  ;;  %v2465_v3 = vpack.c.bf16 %v865_v57, %v849_v55  ;;  %v652_v6 = vadd.f32 %v651_v60, %v2844_v36  ;;  %1185 = vmatprep.mubr.f32.mxu0 %v2658_v0  ;;  %1274 = vmatprep.mubr.f32.mxu1 %v2658_v0 }
 0x129   :  { %v2473_v4 = vpack.c.bf16 %v867_v58, %v851_v56  ;;  %v565_v7 = vadd.f32 %v564_v63, %v2844_v36  ;;  %v654_v8 = vadd.f32 %v653_v1, %v2844_v36  ;;  %v880_v17 = vmax.f32 %v563_v5, 0.0 }
 0x12a   :  { %v568_v9 = vpop.f32.mrb[22].mxu0  ;;  %2466 = vmatprep.subr.bf16.mxu0 %v2465_v3  ;;  %v882_v18 = vmax.f32 %v652_v6, 0.0 }
 0x12b   :  { %v657_v10 = vpop.f32.mrb[22].mxu1  ;;  %2474 = vmatprep.subr.bf16.mxu1 %v2473_v4  ;;  %v569_v11 = vadd.f32 %v568_v9, %v2854_v2  ;;  %2402 = vmatmul.mubr.msk.f32.gmra.mrb[42].mxu0 %vm928_vm2, %v2825_v23  ;;  %v570_v13 = vpop.f32.mrb[23].mxu0  ;;  %v881_v21 = vmax.f32 %v565_v7, 0.0  ;;  %v883_v24 = vmax.f32 %v654_v8, 0.0 }
 0x12c   :  { %v658_v12 = vadd.f32 %v657_v10, %v2854_v2  ;;  %v659_v14 = vpop.f32.mrb[23].mxu1  ;;  %2476 = vmatpush1.bf16.msra.mxu1 %v2475_v62  ;;  %v571_v15 = vadd.f32 %v570_v13, %v2854_v2  ;;  %2468 = vmatpush1.bf16.msra.mxu0 %v2467_v61 }
 0x12d   :  { %2406 = vmatmul.mubr.msk.f32.gmra.mrb[42].mxu1 %vm928_vm2, %v2825_v23  ;;  %v660_v16 = vadd.f32 %v659_v14, %v2854_v2  ;;  %v896_v19 = vmax.f32 %v569_v11, 0.0  ;;  %1191 = vmatprep.mubr.f32.mxu0 %v2658_v0 }
 0x12e   :  { %v898_v20 = vmax.f32 %v658_v12, 0.0  ;;  %1280 = vmatprep.mubr.f32.mxu1 %v2658_v0  ;;  %v897_v29 = vmax.f32 %v571_v15, 0.0  ;;  %v728_v31 = vpop.f32.mrb[24].mxu0 }
 0x12f   :  { %v899_v30 = vmax.f32 %v660_v16, 0.0  ;;  %v817_v32 = vpop.f32.mrb[24].mxu1  ;;  %v2471_v34 = vpack.c.bf16 %v896_v19, %v880_v17  ;;  %2403 = vmatmul.mubr.msk.f32.gmra.mrb[44].mxu0 %vm928_vm2, %v2829_v25  ;;  %v730_v37 = vpop.f32.mrb[25].mxu0  ;;  %v729_v41 = vadd.f32 %v728_v31, %v2838_v28 }
 0x130   :  { %v2479_v35 = vpack.c.bf16 %v898_v20, %v882_v18  ;;  %v819_v38 = vpop.f32.mrb[25].mxu1  ;;  %v2469_v39 = vpack.c.bf16 %v897_v29, %v881_v21  ;;  %v818_v42 = vadd.f32 %v817_v32, %v2838_v28  ;;  %1197 = vmatprep.mubr.f32.mxu0 %v2658_v0  ;;  %v731_v43 = vadd.f32 %v730_v37, %v2838_v28 }
 0x131   :  { %v2477_v40 = vpack.c.bf16 %v899_v30, %v883_v24  ;;  %2407 = vmatmul.mubr.msk.f32.gmra.mrb[44].mxu1 %vm928_vm2, %v2829_v25  ;;  %v820_v44 = vadd.f32 %v819_v38, %v2838_v28  ;;  %v852_v52 = vmax.f32 %v729_v41, 0.0 }
 0x132   :  { %1286 = vmatprep.mubr.f32.mxu1 %v2658_v0  ;;  %v734_v45 = vpop.f32.mrb[26].mxu0  ;;  %2470 = vmatprep.subr.bf16.mxu0 %v2469_v39  ;;  %v854_v53 = vmax.f32 %v818_v42, 0.0  ;;  %v853_v56 = vmax.f32 %v731_v43, 0.0 }
 0x133   :  { %v823_v46 = vpop.f32.mrb[26].mxu1  ;;  %2478 = vmatprep.subr.bf16.mxu1 %v2477_v40  ;;  %v735_v47 = vadd.f32 %v734_v45, %v2840_v33  ;;  %2404 = vmatmul.mubr.msk.f32.gmra.mrb[46].mxu0 %vm928_vm2, %v2831_v26  ;;  %v736_v49 = vpop.f32.mrb[27].mxu0  ;;  %v855_v57 = vmax.f32 %v820_v44, 0.0 }
 0x134   :  { %v824_v48 = vadd.f32 %v823_v46, %v2840_v33  ;;  %v825_v50 = vpop.f32.mrb[27].mxu1  ;;  %2480 = vmatpush1.bf16.msra.mxu1 %v2479_v35  ;;  %v737_v51 = vadd.f32 %v736_v49, %v2840_v33  ;;  %2472 = vmatpush1.bf16.msra.mxu0 %v2471_v34 }
 0x135   :  { %2408 = vmatmul.mubr.msk.f32.gmra.mrb[46].mxu1 %vm928_vm2, %v2831_v26  ;;  %v826_v28 = vadd.f32 %v825_v50, %v2840_v33  ;;  %v868_v54 = vmax.f32 %v735_v47, 0.0  ;;  %1357 = vmatprep.mubr.f32.mxu0 %v2658_v0 }
 0x136   :  { %v870_v55 = vmax.f32 %v824_v48, 0.0  ;;  %1446 = vmatprep.mubr.f32.mxu1 %v2658_v0  ;;  %v869_v58 = vmax.f32 %v737_v51, 0.0  ;;  %v740_v60 = vpop.f32.mrb[28].mxu0 }
 0x137   :  { %v871_v59 = vmax.f32 %v826_v28, 0.0  ;;  %v829_v61 = vpop.f32.mrb[28].mxu1  ;;  %v2483_v62 = vpack.c.bf16 %v868_v54, %v852_v52  ;;  %2409 = vmatmul.mubr.msk.f32.vlgmr.msra.gmra.mrb[48].mxu0 %vm928_vm2, %v2823_v22  ;;  %v742_v33 = vpop.f32.mrb[29].mxu0  ;;  %v741_v5 = vadd.f32 %v740_v60, %v2844_v36 }
 0x138   :  { %v2491_v63 = vpack.c.bf16 %v870_v55, %v854_v53  ;;  %v831_v1 = vpop.f32.mrb[29].mxu1  ;;  %v2481_v3 = vpack.c.bf16 %v869_v58, %v853_v56  ;;  %v830_v6 = vadd.f32 %v829_v61, %v2844_v36  ;;  %1363 = vmatprep.mubr.f32.mxu0 %v2658_v0  ;;  %v743_v7 = vadd.f32 %v742_v33, %v2844_v36 }
 0x139   :  { %v2489_v4 = vpack.c.bf16 %v871_v59, %v855_v57  ;;  %2413 = vmatmul.mubr.msk.f32.vlgmr.msra.gmra.mrb[48].mxu1 %vm928_vm2, %v2823_v22  ;;  %v832_v8 = vadd.f32 %v831_v1, %v2844_v36  ;;  %v884_v16 = vmax.f32 %v741_v5, 0.0 }
 0x13a   :  { %1452 = vmatprep.mubr.f32.mxu1 %v2658_v0  ;;  %v746_v9 = vpop.f32.mrb[30].mxu0  ;;  %2482 = vmatprep.subr.bf16.mxu0 %v2481_v3  ;;  %v886_v17 = vmax.f32 %v830_v6, 0.0  ;;  %v885_v20 = vmax.f32 %v743_v7, 0.0 }
 0x13b   :  { %v835_v10 = vpop.f32.mrb[30].mxu1  ;;  %2490 = vmatprep.subr.bf16.mxu1 %v2489_v4  ;;  %v747_v11 = vadd.f32 %v746_v9, %v2854_v2  ;;  %2410 = vmatmul.mubr.msk.f32.gmra.mrb[50].mxu0 %vm928_vm2, %v2825_v23  ;;  %v748_v13 = vpop.f32.mrb[31].mxu0  ;;  %v887_v21 = vmax.f32 %v832_v8, 0.0 }
 0x13c   :  { %v836_v12 = vadd.f32 %v835_v10, %v2854_v2  ;;  %v837_v14 = vpop.f32.mrb[31].mxu1  ;;  %2492 = vmatpush1.bf16.msra.mxu1 %v2491_v63  ;;  %v749_v15 = vadd.f32 %v748_v13, %v2854_v2  ;;  %2484 = vmatpush1.bf16.msra.mxu0 %v2483_v62 }
 0x13d   :  { %2414 = vmatmul.mubr.msk.f32.gmra.mrb[50].mxu1 %vm928_vm2, %v2825_v23  ;;  %v838_v36 = vadd.f32 %v837_v14, %v2854_v2  ;;  %v900_v18 = vmax.f32 %v747_v11, 0.0  ;;  %1369 = vmatprep.mubr.f32.mxu0 %v2658_v0 }
 0x13e   :  { %v902_v19 = vmax.f32 %v836_v12, 0.0  ;;  %1458 = vmatprep.mubr.f32.mxu1 %v2658_v0  ;;  %v901_v24 = vmax.f32 %v749_v15, 0.0 }
 0x13f   :  { %v903_v29 = vmax.f32 %v838_v36, 0.0  ;;  %v2487_v30 = vpack.c.bf16 %v900_v18, %v884_v16  ;;  %2411 = vmatmul.mubr.msk.f32.gmra.mrb[52].mxu0 %vm928_vm2, %v2829_v25 }
 0x140   :  { %v2495_v31 = vpack.c.bf16 %v902_v19, %v886_v17  ;;  %v2485_v32 = vpack.c.bf16 %v901_v24, %v885_v20  ;;  %1375 = vmatprep.mubr.f32.mxu0 %v2658_v0 }
 0x141   :  { %v2493_v2 = vpack.c.bf16 %v903_v29, %v887_v21  ;;  %2415 = vmatmul.mubr.msk.f32.gmra.mrb[52].mxu1 %vm928_vm2, %v2829_v25 }
 0x142   :  { %1464 = vmatprep.mubr.f32.mxu1 %v2658_v0  ;;  %2486 = vmatprep.subr.bf16.mxu0 %v2485_v32 }
 0x143   :  { %2494 = vmatprep.subr.bf16.mxu1 %v2493_v2  ;;  %2412 = vmatmul.mubr.msk.f32.gmra.mrb[54].mxu0 %vm928_vm2, %v2831_v26 }
 0x144   :  { %2496 = vmatpush1.bf16.msra.mxu1 %v2495_v31  ;;  %2488 = vmatpush1.bf16.msra.mxu0 %v2487_v30 }
 0x145   :  { %2416 = vmatmul.mubr.msk.f32.gmra.mrb[54].mxu1 %vm928_vm2, %v2831_v26  ;;  %1535 = vmatprep.mubr.f32.mxu0 %v2658_v0 }
 0x146   :  { %1624 = vmatprep.mubr.f32.mxu1 %v2658_v0 }
 0x147   :  { %2417 = vmatmul.mubr.msk.f32.vlgmr.msra.gmra.mrb[56].mxu0 %vm928_vm2, %v2823_v22 }
 0x148   :  { %1541 = vmatprep.mubr.f32.mxu0 %v2658_v0 }
 0x149   :  { %2421 = vmatmul.mubr.msk.f32.vlgmr.msra.gmra.mrb[56].mxu1 %vm928_vm2, %v2823_v22  ;;  %v3006_v22 = vpop.permute.xlu1 %915 }
 0x14a   :  { %1630 = vmatprep.mubr.f32.mxu1 %v2658_v0 }
 0x14b   :  { %2418 = vmatmul.mubr.msk.f32.gmra.mrb[58].mxu0 %vm928_vm2, %v2825_v23 }
 0x14c   :  { %1547 = vmatprep.mubr.f32.mxu0 %v2658_v0 }
 0x14d   :  { %2422 = vmatmul.mubr.msk.f32.gmra.mrb[58].mxu1 %vm928_vm2, %v2825_v23  ;;  %v3008_v23 = vpop.permute.xlu0 %910  ;;  %v3018_v49 = vpop.permute.xlu1 %920 }
 0x14e   :  { %1636 = vmatprep.mubr.f32.mxu1 %v2658_v0 }
 0x14f   :  { %2419 = vmatmul.mubr.msk.f32.gmra.mrb[60].mxu0 %vm928_vm2, %v2829_v25 }
 0x150   :  { %1553 = vmatprep.mubr.f32.mxu0 %v2658_v0 }
 0x151   :  { %2423 = vmatmul.mubr.msk.f32.gmra.mrb[60].mxu1 %vm928_vm2, %v2829_v25  ;;  %v3020_v1 = vpop.permute.xlu0 %925 }
 0x152   :  { %1642 = vmatprep.mubr.f32.mxu1 %v2658_v0 }
 0x153   :  { %2420 = vmatmul.mubr.msk.f32.gmra.mrb[62].mxu0 %vm928_vm2, %v2831_v26 }
 0x154   :  { %1785 = vmatprep.mubr.f32.mxu0 %v2658_v0 }
 0x155   :  { %2424 = vmatmul.mubr.msk.f32.gmra.mrb[62].mxu1 %vm928_vm2, %v2831_v26 }
 0x156   :  { %1856 = vmatprep.mubr.f32.mxu1 %v2658_v0 }
 0x1e9   :  { %v1003_v34 = vpop.f32.mrb[32].mxu0 }
 0x1ea   :  { %v1092_v25 = vpop.f32.mrb[32].mxu1  ;;  %v1005_v35 = vpop.f32.mrb[33].mxu0  ;;  %v1004_v38 = vadd.f32 %v1003_v34, %v3008_v23 }
 0x1eb   :  { %v1094_v37 = vpop.f32.mrb[33].mxu1  ;;  %v1093_v39 = vadd.f32 %v1092_v25, %v3008_v23  ;;  %v1006_v26 = vadd.f32 %v1005_v35, %v3008_v23 }
 0x1ec   :  { %v1095_v42 = vadd.f32 %v1094_v37, %v3008_v23  ;;  %v1649_v50 = vmax.f32 %v1004_v38, 0.0 }
 0x1ed   :  { %v1009_v40 = vpop.f32.mrb[34].mxu0  ;;  %v1651_v28 = vmax.f32 %v1093_v39, 0.0  ;;  %v1650_v53 = vmax.f32 %v1006_v26, 0.0 }
 0x1ee   :  { %v1098_v41 = vpop.f32.mrb[34].mxu1  ;;  %v1011_v43 = vpop.f32.mrb[35].mxu0  ;;  %v1010_v45 = vadd.f32 %v1009_v40, %v3006_v22  ;;  %v1652_v55 = vmax.f32 %v1095_v42, 0.0 }
 0x1ef   :  { %v1100_v44 = vpop.f32.mrb[35].mxu1  ;;  %v1099_v46 = vadd.f32 %v1098_v41, %v3006_v22  ;;  %v1012_v47 = vadd.f32 %v1011_v43, %v3006_v22 }
 0x1f0   :  { %v1101_v48 = vadd.f32 %v1100_v44, %v3006_v22  ;;  %v1665_v51 = vmax.f32 %v1010_v45, 0.0 }
 0x1f1   :  { %v1667_v52 = vmax.f32 %v1099_v46, 0.0  ;;  %v1666_v54 = vmax.f32 %v1012_v47, 0.0  ;;  %v1015_v57 = vpop.f32.mrb[36].mxu0 }
 0x1f2   :  { %v1668_v56 = vmax.f32 %v1101_v48, 0.0  ;;  %v1104_v58 = vpop.f32.mrb[36].mxu1  ;;  %v1017_v59 = vpop.f32.mrb[37].mxu0  ;;  %v2499_v61 = vpack.c.bf16 %v1665_v51, %v1649_v50  ;;  %v1016_v3 = vadd.f32 %v1015_v57, %v3018_v49 }
 0x1f3   :  { %v1106_v60 = vpop.f32.mrb[37].mxu1  ;;  %v2507_v62 = vpack.c.bf16 %v1667_v52, %v1651_v28  ;;  %v2497_v63 = vpack.c.bf16 %v1666_v54, %v1650_v53  ;;  %v1105_v4 = vadd.f32 %v1104_v58, %v3018_v49  ;;  %v1018_v7 = vadd.f32 %v1017_v59, %v3018_v49 }
 0x1f4   :  { %v2505_v33 = vpack.c.bf16 %v1668_v56, %v1652_v55  ;;  %v1107_v8 = vadd.f32 %v1106_v60, %v3018_v49  ;;  %v1681_v15 = vmax.f32 %v1016_v3, 0.0 }
 0x1f5   :  { %v1021_v5 = vpop.f32.mrb[38].mxu0  ;;  %2498 = vmatprep.subr.bf16.mxu0 %v2497_v63  ;;  %v1683_v16 = vmax.f32 %v1105_v4, 0.0  ;;  %v1682_v18 = vmax.f32 %v1018_v7, 0.0 }
 0x1f6   :  { %v1110_v6 = vpop.f32.mrb[38].mxu1  ;;  %2506 = vmatprep.subr.bf16.mxu1 %v2505_v33  ;;  %v1023_v9 = vpop.f32.mrb[39].mxu0  ;;  %2500 = vmatpush1.bf16.msra.mxu0 %v2499_v61  ;;  %v1022_v11 = vadd.f32 %v1021_v5, %v3020_v1  ;;  %v1684_v20 = vmax.f32 %v1107_v8, 0.0 }
 0x1f7   :  { %v1112_v10 = vpop.f32.mrb[39].mxu1  ;;  %2508 = vmatpush1.bf16.msra.mxu1 %v2507_v62  ;;  %v1111_v12 = vadd.f32 %v1110_v6, %v3020_v1  ;;  %v1024_v13 = vadd.f32 %v1023_v9, %v3020_v1 }
 0x1f8   :  { %v1113_v14 = vadd.f32 %v1112_v10, %v3020_v1  ;;  %v1697_v36 = vmax.f32 %v1022_v11, 0.0 }
 0x1f9   :  { %v1699_v17 = vmax.f32 %v1111_v12, 0.0  ;;  %v1698_v19 = vmax.f32 %v1024_v13, 0.0 }
 0x1fa   :  { %v1700_v21 = vmax.f32 %v1113_v14, 0.0  ;;  %v1181_v24 = vpop.f32.mrb[40].mxu0  ;;  %v2503_v29 = vpack.c.bf16 %v1697_v36, %v1681_v15  ;;  %v1270_v2 = vpop.f32.mrb[40].mxu1 }
 0x1fb   :  { %v2511_v30 = vpack.c.bf16 %v1699_v17, %v1683_v16  ;;  %v2501_v31 = vpack.c.bf16 %v1698_v19, %v1682_v18  ;;  %v1183_v34 = vpop.f32.mrb[41].mxu0  ;;  %v1272_v25 = vpop.f32.mrb[41].mxu1  ;;  %v1182_v35 = vadd.f32 %v1181_v24, %v3008_v23  ;;  %v1271_v37 = vadd.f32 %v1270_v2, %v3008_v23 }
 0x1fc   :  { %v2509_v32 = vpack.c.bf16 %v1700_v21, %v1684_v20  ;;  %v1184_v38 = vadd.f32 %v1183_v34, %v3008_v23  ;;  %v1273_v40 = vadd.f32 %v1272_v25, %v3008_v23 }
 0x1fd   :  { %2502 = vmatprep.subr.bf16.mxu0 %v2501_v31  ;;  %v1653_v46 = vmax.f32 %v1182_v35, 0.0  ;;  %v1655_v50 = vmax.f32 %v1271_v37, 0.0 }
 0x1fe   :  { %2510 = vmatprep.subr.bf16.mxu1 %v2509_v32  ;;  %v1187_v39 = vpop.f32.mrb[42].mxu0  ;;  %2504 = vmatpush1.bf16.msra.mxu0 %v2503_v29  ;;  %v1654_v51 = vmax.f32 %v1184_v38, 0.0  ;;  %v1656_v54 = vmax.f32 %v1273_v40, 0.0 }
 0x1ff   :  { %2512 = vmatpush1.bf16.msra.mxu1 %v2511_v30  ;;  %v1188_v41 = vadd.f32 %v1187_v39, %v3006_v22  ;;  %v1189_v42 = vpop.f32.mrb[43].mxu0 }
 0x200   :  { %v1276_v26 = vpop.f32.mrb[42].mxu1  ;;  %v1190_v44 = vadd.f32 %v1189_v42, %v3006_v22 }
 0x201   :  { %v1277_v43 = vadd.f32 %v1276_v26, %v3006_v22  ;;  %v1278_v45 = vpop.f32.mrb[43].mxu1  ;;  %v1669_v47 = vmax.f32 %v1188_v41, 0.0  ;;  %2425 = vmatmul.mubr.msk.f32.vlgmr.msra.gmra.mrb[64].mxu0 %vm928_vm2, %v2835_v27 }
 0x202   :  { %v1279_v48 = vadd.f32 %v1278_v45, %v3006_v22  ;;  %2426 = vmatmul.mubr.msk.f32.vlgmr.msra.gmra.mrb[64].mxu1 %vm928_vm2, %v2835_v27  ;;  %v1670_v52 = vmax.f32 %v1190_v44, 0.0  ;;  %v1193_v53 = vpop.f32.mrb[44].mxu0  ;;  %1927 = vmatprep.mubr.f32.mxu0 %v2658_v0 }
 0x203   :  { %v1671_v28 = vmax.f32 %v1277_v43, 0.0  ;;  %1998 = vmatprep.mubr.f32.mxu1 %v2658_v0  ;;  %v2515_v55 = vpack.c.bf16 %v1669_v47, %v1653_v46  ;;  %v1195_v58 = vpop.f32.mrb[45].mxu0  ;;  %v1194_v63 = vadd.f32 %v1193_v53, %v3018_v49 }
 0x204   :  { %v1672_v56 = vmax.f32 %v1279_v48, 0.0  ;;  %v1282_v57 = vpop.f32.mrb[44].mxu1  ;;  %v2513_v60 = vpack.c.bf16 %v1670_v52, %v1654_v51  ;;  %v1196_v3 = vadd.f32 %v1195_v58, %v3018_v49 }
 0x205   :  { %v2523_v59 = vpack.c.bf16 %v1671_v28, %v1655_v50  ;;  %v1284_v61 = vpop.f32.mrb[45].mxu1  ;;  %v1283_v33 = vadd.f32 %v1282_v57, %v3018_v49  ;;  %v1685_v12 = vmax.f32 %v1194_v63, 0.0 }
 0x206   :  { %v2521_v62 = vpack.c.bf16 %v1672_v56, %v1656_v54  ;;  %v1199_v4 = vpop.f32.mrb[46].mxu0  ;;  %2514 = vmatprep.subr.bf16.mxu0 %v2513_v60  ;;  %v1285_v5 = vadd.f32 %v1284_v61, %v3018_v49  ;;  %v1686_v36 = vmax.f32 %v1196_v3, 0.0 }
 0x207   :  { %v1200_v6 = vadd.f32 %v1199_v4, %v3020_v1  ;;  %v1201_v8 = vpop.f32.mrb[47].mxu0  ;;  %2516 = vmatpush1.bf16.msra.mxu0 %v2515_v55  ;;  %v1687_v15 = vmax.f32 %v1283_v33, 0.0 }
 0x208   :  { %v1288_v7 = vpop.f32.mrb[46].mxu1  ;;  %2522 = vmatprep.subr.bf16.mxu1 %v2521_v62  ;;  %v1202_v10 = vadd.f32 %v1201_v8, %v3020_v1  ;;  %v1688_v19 = vmax.f32 %v1285_v5, 0.0 }
 0x209   :  { %v1289_v9 = vadd.f32 %v1288_v7, %v3020_v1  ;;  %v1290_v11 = vpop.f32.mrb[47].mxu1  ;;  %2524 = vmatpush1.bf16.msra.mxu1 %v2523_v59  ;;  %v1701_v13 = vmax.f32 %v1200_v6, 0.0 }
 0x20a   :  { %v1291_v14 = vadd.f32 %v1290_v11, %v3020_v1  ;;  %v1702_v17 = vmax.f32 %v1202_v10, 0.0  ;;  %v1359_v18 = vpop.f32.mrb[48].mxu0 }
 0x20b   :  { %v1703_v16 = vmax.f32 %v1289_v9, 0.0  ;;  %v2519_v20 = vpack.c.bf16 %v1701_v13, %v1685_v12  ;;  %v1361_v29 = vpop.f32.mrb[49].mxu0  ;;  %v1360_v34 = vadd.f32 %v1359_v18, %v3008_v23 }
 0x20c   :  { %v1704_v21 = vmax.f32 %v1291_v14, 0.0  ;;  %v1448_v24 = vpop.f32.mrb[48].mxu1  ;;  %v2517_v31 = vpack.c.bf16 %v1702_v17, %v1686_v36  ;;  %v1362_v35 = vadd.f32 %v1361_v29, %v3008_v23 }
 0x20d   :  { %v2527_v30 = vpack.c.bf16 %v1703_v16, %v1687_v15  ;;  %v1450_v32 = vpop.f32.mrb[49].mxu1  ;;  %v1449_v25 = vadd.f32 %v1448_v24, %v3008_v23  ;;  %v1657_v44 = vmax.f32 %v1360_v34, 0.0 }
 0x20e   :  { %v2525_v2 = vpack.c.bf16 %v1704_v21, %v1688_v19  ;;  %v1365_v37 = vpop.f32.mrb[50].mxu0  ;;  %2518 = vmatprep.subr.bf16.mxu0 %v2517_v31  ;;  %v1451_v38 = vadd.f32 %v1450_v32, %v3008_v23  ;;  %v1658_v48 = vmax.f32 %v1362_v35, 0.0 }
 0x20f   :  { %v1366_v39 = vadd.f32 %v1365_v37, %v3006_v22  ;;  %v1367_v41 = vpop.f32.mrb[51].mxu0  ;;  %2520 = vmatpush1.bf16.msra.mxu0 %v2519_v20  ;;  %v1659_v47 = vmax.f32 %v1449_v25, 0.0 }
 0x210   :  { %v1454_v40 = vpop.f32.mrb[50].mxu1  ;;  %2526 = vmatprep.subr.bf16.mxu1 %v2525_v2  ;;  %v1368_v42 = vadd.f32 %v1367_v41, %v3006_v22  ;;  %v1660_v52 = vmax.f32 %v1451_v38, 0.0 }
 0x211   :  { %v1455_v26 = vadd.f32 %v1454_v40, %v3006_v22  ;;  %v1456_v43 = vpop.f32.mrb[51].mxu1  ;;  %2528 = vmatpush1.bf16.msra.mxu1 %v2527_v30  ;;  %v1673_v45 = vmax.f32 %v1366_v39, 0.0 }
 0x212   :  { %v1457_v46 = vadd.f32 %v1456_v43, %v3006_v22  ;;  %v1674_v51 = vmax.f32 %v1368_v42, 0.0  ;;  %v1371_v28 = vpop.f32.mrb[52].mxu0  ;;  %2427 = vmatmul.mubr.msk.f32.vlgmr.msra.gmra.mrb[66].mxu0 %vm928_vm2, %v2835_v27 }
 0x213   :  { %v1675_v50 = vmax.f32 %v1455_v26, 0.0  ;;  %v2531_v53 = vpack.c.bf16 %v1673_v45, %v1657_v44  ;;  %v1373_v56 = vpop.f32.mrb[53].mxu0  ;;  %2069 = vmatprep.mubr.f32.mxu0 %v2658_v0  ;;  %v1372_v61 = vadd.f32 %v1371_v28, %v3018_v49 }
 0x214   :  { %v1676_v54 = vmax.f32 %v1457_v46, 0.0  ;;  %v1460_v55 = vpop.f32.mrb[52].mxu1  ;;  %2428 = vmatmul.mubr.msk.f32.vlgmr.msra.gmra.mrb[66].mxu1 %vm928_vm2, %v2835_v27  ;;  %v2529_v58 = vpack.c.bf16 %v1674_v51, %v1658_v48  ;;  %v1374_v63 = vadd.f32 %v1373_v56, %v3018_v49  ;;  %v2581_v48 = vld [vmem:[#allocation5 + $0x40] sm:$0x7] }
 0x215   :  { %v2539_v57 = vpack.c.bf16 %v1675_v50, %v1659_v47  ;;  %v1462_v59 = vpop.f32.mrb[53].mxu1  ;;  %2140 = vmatprep.mubr.f32.mxu1 %v2658_v0  ;;  %v1461_v62 = vadd.f32 %v1460_v55, %v3018_v49  ;;  %v1689_v9 = vmax.f32 %v1372_v61, 0.0 }
 0x216   :  { %v2537_v60 = vpack.c.bf16 %v1676_v54, %v1660_v52  ;;  %v1377_v33 = vpop.f32.mrb[54].mxu0  ;;  %2530 = vmatprep.subr.bf16.mxu0 %v2529_v58  ;;  %v1463_v3 = vadd.f32 %v1462_v59, %v3018_v49  ;;  %v1690_v13 = vmax.f32 %v1374_v63, 0.0 }
 0x217   :  { %v1378_v27 = vadd.f32 %v1377_v33, %v3020_v1  ;;  %v1379_v5 = vpop.f32.mrb[55].mxu0  ;;  %2532 = vmatpush1.bf16.msra.mxu0 %v2531_v53  ;;  %v1691_v12 = vmax.f32 %v1461_v62, 0.0 }
 0x218   :  { %v1466_v4 = vpop.f32.mrb[54].mxu1  ;;  %2538 = vmatprep.subr.bf16.mxu1 %v2537_v60  ;;  %v1380_v7 = vadd.f32 %v1379_v5, %v3020_v1  ;;  %v1692_v16 = vmax.f32 %v1463_v3, 0.0 }
 0x219   :  { %v1467_v6 = vadd.f32 %v1466_v4, %v3020_v1  ;;  %v1468_v8 = vpop.f32.mrb[55].mxu1  ;;  %2540 = vmatpush1.bf16.msra.mxu1 %v2539_v57  ;;  %v1705_v10 = vmax.f32 %v1378_v27, 0.0 }
 0x21a   :  { %v1469_v11 = vadd.f32 %v1468_v8, %v3020_v1  ;;  %v1706_v15 = vmax.f32 %v1380_v7, 0.0  ;;  %v1537_v36 = vpop.f32.mrb[56].mxu0 }
 0x21b   :  { %v1707_v14 = vmax.f32 %v1467_v6, 0.0  ;;  %v2535_v17 = vpack.c.bf16 %v1705_v10, %v1689_v9  ;;  %v1539_v20 = vpop.f32.mrb[57].mxu0  ;;  %v1538_v31 = vadd.f32 %v1537_v36, %v3008_v23  ;;  %v1717_v36 = vpop.permute.xlu1 %1716 }
 0x21c   :  { %v1708_v18 = vmax.f32 %v1469_v11, 0.0  ;;  %v1626_v19 = vpop.f32.mrb[56].mxu1  ;;  %v2533_v24 = vpack.c.bf16 %v1706_v15, %v1690_v13  ;;  %v1540_v2 = vadd.f32 %v1539_v20, %v3008_v23 }
 0x21d   :  { %v2543_v21 = vpack.c.bf16 %v1707_v14, %v1691_v12  ;;  %v1628_v29 = vpop.f32.mrb[57].mxu1  ;;  %v1627_v32 = vadd.f32 %v1626_v19, %v3008_v23  ;;  %v1661_v26 = vmax.f32 %v1538_v31, 0.0 }
 0x21e   :  { %v2541_v30 = vpack.c.bf16 %v1708_v18, %v1692_v16  ;;  %v1543_v34 = vpop.f32.mrb[58].mxu0  ;;  %2534 = vmatprep.subr.bf16.mxu0 %v2533_v24  ;;  %v1629_v25 = vadd.f32 %v1628_v29, %v3008_v23  ;;  %v1662_v45 = vmax.f32 %v1540_v2, 0.0 }
 0x21f   :  { %v1544_v35 = vadd.f32 %v1543_v34, %v3006_v22  ;;  %v1545_v38 = vpop.f32.mrb[59].mxu0  ;;  %2536 = vmatpush1.bf16.msra.mxu0 %v2535_v17  ;;  %v1663_v44 = vmax.f32 %v1627_v32, 0.0 }
 0x220   :  { %v1632_v37 = vpop.f32.mrb[58].mxu1  ;;  %2542 = vmatprep.subr.bf16.mxu1 %v2541_v30  ;;  %v1546_v40 = vadd.f32 %v1545_v38, %v3006_v22  ;;  %v1664_v50 = vmax.f32 %v1629_v25, 0.0 }
 0x221   :  { %v1633_v39 = vadd.f32 %v1632_v37, %v3006_v22  ;;  %v1634_v41 = vpop.f32.mrb[59].mxu1  ;;  %2544 = vmatpush1.bf16.msra.mxu1 %v2543_v21  ;;  %v1677_v42 = vmax.f32 %v1544_v35, 0.0 }
 0x222   :  { %v1635_v43 = vadd.f32 %v1634_v41, %v3006_v22  ;;  %v1678_v23 = vmax.f32 %v1546_v40, 0.0  ;;  %v1549_v47 = vpop.f32.mrb[60].mxu0  ;;  %2429 = vmatmul.mubr.msk.f32.vlgmr.msra.gmra.mrb[68].mxu0 %vm928_vm2, %v2581_v48 }
 0x223   :  { %v1679_v46 = vmax.f32 %v1633_v39, 0.0  ;;  %v2547_v51 = vpack.c.bf16 %v1677_v42, %v1661_v26  ;;  %v1551_v53 = vpop.f32.mrb[61].mxu0  ;;  %2211 = vmatprep.mubr.f32.mxu0 %v2658_v0  ;;  %v1550_v57 = vadd.f32 %v1549_v47, %v3018_v49 }
 0x224   :  { %v1680_v28 = vmax.f32 %v1635_v43, 0.0  ;;  %v1638_v52 = vpop.f32.mrb[60].mxu1  ;;  %2430 = vmatmul.mubr.msk.f32.vlgmr.msra.gmra.mrb[68].mxu1 %vm928_vm2, %v2581_v48  ;;  %v2545_v55 = vpack.c.bf16 %v1678_v23, %v1662_v45  ;;  %v1552_v59 = vadd.f32 %v1551_v53, %v3018_v49 }
 0x225   :  { %v2555_v54 = vpack.c.bf16 %v1679_v46, %v1663_v44  ;;  %v1640_v22 = vpop.f32.mrb[61].mxu1  ;;  %2282 = vmatprep.mubr.f32.mxu1 %v2658_v0  ;;  %v1639_v58 = vadd.f32 %v1638_v52, %v3018_v49  ;;  %v1693_v4 = vmax.f32 %v1550_v57, 0.0 }
 0x226   :  { %v2553_v56 = vpack.c.bf16 %v1680_v28, %v1664_v50  ;;  %v1555_v60 = vpop.f32.mrb[62].mxu0  ;;  %2546 = vmatprep.subr.bf16.mxu0 %v2545_v55  ;;  %v1641_v61 = vadd.f32 %v1640_v22, %v3018_v49  ;;  %v1694_v8 = vmax.f32 %v1552_v59, 0.0 }
 0x227   :  { %v1556_v62 = vadd.f32 %v1555_v60, %v3020_v1  ;;  %v1557_v33 = vpop.f32.mrb[63].mxu0  ;;  %2548 = vmatpush1.bf16.msra.mxu0 %v2547_v51  ;;  %v1695_v7 = vmax.f32 %v1639_v58, 0.0 }
 0x228   :  { %v1644_v63 = vpop.f32.mrb[62].mxu1  ;;  %2554 = vmatprep.subr.bf16.mxu1 %v2553_v56  ;;  %v1558_v0 = vadd.f32 %v1557_v33, %v3020_v1  ;;  %v1696_v10 = vmax.f32 %v1641_v61, 0.0 }
 0x229   :  { %v1645_v3 = vadd.f32 %v1644_v63, %v3020_v1  ;;  %v1646_v27 = vpop.f32.mrb[63].mxu1  ;;  %2556 = vmatpush1.bf16.msra.mxu1 %v2555_v54  ;;  %v1709_v5 = vmax.f32 %v1556_v62, 0.0 }
 0x22a   :  { %v1647_v6 = vadd.f32 %v1646_v27, %v3020_v1  ;;  %v1710_v49 = vmax.f32 %v1558_v0, 0.0 }
 0x22b   :  { %v1711_v9 = vmax.f32 %v1645_v3, 0.0  ;;  %v2551_v11 = vpack.c.bf16 %v1709_v5, %v1693_v4 }
 0x22c   :  { %v1712_v12 = vmax.f32 %v1647_v6, 0.0  ;;  %v2549_v14 = vpack.c.bf16 %v1710_v49, %v1694_v8 }
 0x22d   :  { %v2559_v13 = vpack.c.bf16 %v1711_v9, %v1695_v7 }
 0x22e   :  { %v2557_v15 = vpack.c.bf16 %v1712_v12, %v1696_v10  ;;  %2550 = vmatprep.subr.bf16.mxu0 %v2549_v14 }
 0x22f   :  { %2552 = vmatpush1.bf16.msra.mxu0 %v2551_v11 }
 0x230   :  { %2558 = vmatprep.subr.bf16.mxu1 %v2557_v15 }
 0x231   :  { %2560 = vmatpush1.bf16.msra.mxu1 %v2559_v13 }
 0x232   :  { %2431 = vmatmul.mubr.msk.f32.vlgmr.msra.gmra.mrb[70].mxu0 %vm928_vm2, %v2581_v48 }
 0x234   :  { %2432 = vmatmul.mubr.msk.f32.vlgmr.msra.gmra.mrb[70].mxu1 %vm928_vm2, %v2581_v48 }
 0x2d4   :  { %v1787_v1 = vpop.f32.mrb[64].mxu0 }
 0x2d5   :  { %v1858_v16 = vpop.f32.mrb[64].mxu1  ;;  %v1788_v17 = vadd.f32 %v1787_v1, %v1717_v36  ;;  %v1789_v19 = vpop.f32.mrb[65].mxu0 }
 0x2d6   :  { %v1859_v18 = vadd.f32 %v1858_v16, %v1717_v36  ;;  %v1860_v20 = vpop.f32.mrb[65].mxu1  ;;  %v1790_v21 = vadd.f32 %v1789_v19, %v1717_v36 }
 0x2d7   :  { %v1861_v24 = vadd.f32 %v1860_v20, %v1717_v36 }
 0x2d8   :  { %v2305_v29 = vcombine.low %v1788_v17, %v1790_v21 }
 0x2d9   :  { %v2306_v30 = vcombine.low %v1859_v18, %v1861_v24 }
 0x2da   :  { %2321 = vst [vmem:[#allocation7] sm:$0x77] %v2305_v29 }
 0x2db   :  { %2322 = vst [vmem:[#allocation7 + $0x8] sm:$0x77] %v2306_v30 }
 0x2e5   :  { %v1929_v31 = vpop.f32.mrb[66].mxu0 }
 0x2e6   :  { %v1930_v32 = vadd.f32 %v1929_v31, %v1717_v36  ;;  %v1931_v34 = vpop.f32.mrb[67].mxu0 }
 0x2e7   :  { %v2000_v2 = vpop.f32.mrb[66].mxu1  ;;  %v1932_v35 = vadd.f32 %v1931_v34, %v1717_v36 }
 0x2e8   :  { %v2001_v25 = vadd.f32 %v2000_v2, %v1717_v36  ;;  %v2002_v37 = vpop.f32.mrb[67].mxu1 }
 0x2e9   :  { %v2003_v38 = vadd.f32 %v2002_v37, %v1717_v36  ;;  %v2307_v39 = vcombine.low %v1930_v32, %v1932_v35 }
 0x2eb   :  { %v2308_v40 = vcombine.low %v2001_v25, %v2003_v38  ;;  %2323 = vst [vmem:[#allocation7 + $0x10] sm:$0x77] %v2307_v39 }
 0x2ed   :  { %2324 = vst [vmem:[#allocation7 + $0x18] sm:$0x77] %v2308_v40 }
 0x2f5   :  { %v2071_v41 = vpop.f32.mrb[68].mxu0 }
 0x2f6   :  { %v2072_v26 = vadd.f32 %v2071_v41, %v1717_v36  ;;  %v2073_v43 = vpop.f32.mrb[69].mxu0 }
 0x2f7   :  { %v2142_v42 = vpop.f32.mrb[68].mxu1  ;;  %v2074_v45 = vadd.f32 %v2073_v43, %v1717_v36 }
 0x2f8   :  { %v2143_v44 = vadd.f32 %v2142_v42, %v1717_v36  ;;  %v2144_v46 = vpop.f32.mrb[69].mxu1 }
 0x2f9   :  { %v2145_v23 = vadd.f32 %v2144_v46, %v1717_v36  ;;  %v2309_v47 = vcombine.low %v2072_v26, %v2074_v45 }
 0x2fb   :  { %v2310_v48 = vcombine.low %v2143_v44, %v2145_v23  ;;  %2325 = vst [vmem:[#allocation7 + $0x20] sm:$0x77] %v2309_v47 }
 0x2fd   :  { %2326 = vst [vmem:[#allocation7 + $0x28] sm:$0x77] %v2310_v48 }
 0x305   :  { %v2213_v50 = vpop.f32.mrb[70].mxu0 }
 0x306   :  { %v2214_v51 = vadd.f32 %v2213_v50, %v1717_v36  ;;  %v2215_v52 = vpop.f32.mrb[71].mxu0 }
 0x307   :  { %v2284_v28 = vpop.f32.mrb[70].mxu1  ;;  %v2216_v54 = vadd.f32 %v2215_v52, %v1717_v36 }
 0x308   :  { %v2285_v53 = vadd.f32 %v2284_v28, %v1717_v36  ;;  %v2286_v55 = vpop.f32.mrb[71].mxu1 }
 0x309   :  { %v2287_v22 = vadd.f32 %v2286_v55, %v1717_v36  ;;  %v2311_v56 = vcombine.low %v2214_v51, %v2216_v54 }
 0x30b   :  { %v2312_v57 = vcombine.low %v2285_v53, %v2287_v22  ;;  %2327 = vst [vmem:[#allocation7 + $0x30] sm:$0x77] %v2311_v56 }
 0x30d   :  { %2328 = vst [vmem:[#allocation7 + $0x38] sm:$0x77] %v2312_v57 }
 0x30e   :  { %2637 = shalt.err (!%p2634_p6)
}
 0x30f   :  { %s2638_s10 = scalar_lea.hbm %s3110_s2, 1024 }
 0x310   :  { %p2639_p7 = scmp.ne.s32.totalorder %s3110_s2, %s2638_s10  ;;  %p2642_p8 = scmp.lt.u32.totalorder %s2638_s10, %s3110_s2 }
 0x312   :  { %p2644_p9 = pnand %p2642_p8, %p2639_p7 }
 0x314   :  { %2647 = shalt.err (!%p2644_p9)
}
 0x315   :  { %2338 = dma.vmem_to_hbm [thread:$0]  %s2336_s6, 1024, %s3110_s2, [#allocation4]  }
 0x316   :  { %2652 = dma.done.wait [#allocation4], 1024  }
 0x317   :  { %2653 = vsyncadd [#allocation4], 4294966272 }
 0x318   :  { %2342 = vsyncpa [#allocation3], 1 }
 0x319   :  { %2343 = vsyncpa [#allocation6], 1 }
 0x31a   :  { %2344 = vsyncpa [#allocation4], 1 }

</bundles_post_ra>
